<compile_context>
chip_gen: v7x
topology: tpu7x:2x2x1
jax: 0.10.0
libtpu: 0.0.40
codegen_flags: <defaults>
</compile_context>

<pallas_src>
import math

import jax
import jax.numpy as jnp
from jax.experimental import pallas as pl
from jax.experimental.pallas import tpu as pltpu

TWO_PI = 2.0 * math.pi  # f32(2*pi) == 2 * f32(pi), so rounding matches the reference


def _round_up(n, m):
    return ((n + m - 1) // m) * m


def _cdiv(a, b):
    return (a + b - 1) // b


def _make_kernel(half):
    """Kernel for one batch tile.

    x_ref:   (1, TB)          f32   timesteps, batch on the 128-lane axis
    w_ref:   (H_pad, 1)       f32   frequencies on sublanes (H_pad = round_up(H, 8))
    out_ref: (TB, 2*half + 1) f32   [x | sin | cos] consumer layout
    """

    def kernel(x_ref, w_ref, out_ref):
        tb = x_ref.shape[1]
        x_row = x_ref[...]                                   # (1, TB) lane-dense
        # Same op order as the reference ((x*w)*2pi); lane-dense VPU broadcast mul.
        freqs = (w_ref[...] * x_row) * TWO_PI                # (H_pad, TB)
        sin_t = jnp.sin(freqs)                               # lane-dense EUP work
        cos_t = jnp.cos(freqs)

        # x column: sublane-broadcast then transpose keeps the transpose operand
        # 8-sublane aligned; every column of the transposed block equals x.
        x_col = jnp.broadcast_to(x_row, (8, tb)).T[:, 0:1]   # (TB, 1)

        # XLU relayout to the (TB, .) layout (separate VLIW slot, overlaps EUP),
        # then direct sub-slice stores -- no lane-axis concat assembly.
        out_ref[:, 0:1] = x_col
        out_ref[:, 1:1 + half] = sin_t.T[:, :half]           # (TB, H)
        out_ref[:, 1 + half:] = cos_t.T[:, :half]            # (TB, H)

    return kernel


def _choose_tile(b, *, single_block_max=1024, max_rows_per_tile=4096):
    """Pick (rows_per_tile, num_tiles) for the batch axis."""
    if b <= single_block_max:
        # One grid step: per-step pipeline overhead dominates at this arithmetic
        # intensity and the tiles are KB-scale (VMEM is a non-issue on v5e/v6e/v7x).
        # Padding is <= 7 rows.
        return _round_up(b, 8), 1
    # Large B: an even number (>= 2) of steps so the "parallel" grid axis can be
    # sharded across both v7x TensorCores; x tiles stay multiples of 128 lanes.
    n = max(2, _cdiv(b, max_rows_per_tile))
    n += n % 2
    tb = _round_up(_cdiv(b, n), 128)
    return tb, _cdiv(b, tb)


def random_or_learned_sinusoidal_pos_emb(x, weights):
    """JAX wrapper matching the PyTorch forward.

    x:       (B,)         float timesteps
    weights: (half_dim,)  float frequencies
    returns: (B, 2*half_dim + 1) float32 == [x | sin(2*pi*x*w) | cos(2*pi*x*w)]
    """
    assert x.ndim == 1 and weights.ndim == 1
    b = x.shape[0]
    half = weights.shape[0]
    out_dim = 2 * half + 1

    # Batch-on-lanes operands; weights padded to a sublane multiple (8).
    half_pad = _round_up(half, 8)
    w_col = jnp.pad(weights.astype(jnp.float32), (0, half_pad - half)).reshape(
        half_pad, 1)

    tb, n_tiles = _choose_tile(b)
    padded_b = tb * n_tiles
    x_row = x.astype(jnp.float32).reshape(1, b)
    if padded_b != b:
        x_row = jnp.pad(x_row, ((0, 0), (0, padded_b - b)))

    out = pl.pallas_call(
        _make_kernel(half),
        out_shape=jax.ShapeDtypeStruct((padded_b, out_dim), jnp.float32),
        grid=(n_tiles,),
        in_specs=[
            pl.BlockSpec((1, tb), lambda i: (0, i)),          # x: lane-dense row tile
            pl.BlockSpec((half_pad, 1), lambda i: (0, 0)),    # weights: replicated
        ],
        out_specs=pl.BlockSpec((tb, out_dim), lambda i: (i, 0)),
        compiler_params=pltpu.CompilerParams(
            dimension_semantics=("parallel",)),               # megacore on v7x
    )(x_row, w_col)

    # TODO(synk): the largest remaining win is fusing this embedding into the
    # consumer time-embedding MLP kernel's prologue -- standalone it is pure
    # launch/DMA fixed cost at these sizes.
    return out if padded_b == b else out[:b]  # only the first b rows are returned


def reference(x, weights):
    """Pure-JAX reference mirroring the PyTorch module exactly."""
    xb = x[:, None].astype(jnp.float32)
    freqs = xb * weights[None, :].astype(jnp.float32) * 2.0 * math.pi
    fouriered = jnp.concatenate([jnp.sin(freqs), jnp.cos(freqs)], axis=-1)
    return jnp.concatenate([xb, fouriered], axis=-1)


if __name__ == "__main__":
    key = jax.random.PRNGKey(0)
    k_x, k_w = jax.random.split(key)

    batch = 128                  # one lane-dense (8, 128) tile of timesteps
    dim = 16                     # embedding dimension (even)
    half_dim = dim // 2

    # Deterministic synthetic inputs: continuous-time timesteps in [0, 1) and the
    # torch.randn frequency parameter analogue.
    x = jax.random.uniform(k_x, (batch,), dtype=jnp.float32)
    weights = jax.random.normal(k_w, (half_dim,), dtype=jnp.float32)

    out = jax.block_until_ready(random_or_learned_sinusoidal_pos_emb(x, weights))
    ref = reference(x, weights)

    assert out.shape == (batch, dim + 1), out.shape
    assert jnp.allclose(out, ref, atol=1e-5, rtol=1e-5), "mismatch vs reference"

    print("KERNEL_OK")
</pallas_src>

<mosaic_0001>
module attributes {stable_mosaic.version = 11 : i64} {
  func.func @kernel(%arg0: i32, %arg1: memref<1x128xf32, #tpu.memory_space<vmem>>, %arg2: memref<8x1xf32, #tpu.memory_space<vmem>>, %arg3: memref<128x17xf32, #tpu.memory_space<vmem>>) attributes {dimension_semantics = [#tpu.dimension_semantics<parallel>], iteration_bounds = array<i64: 1>, scalar_prefetch = 0 : i64, scratch_operands = 0 : i64, tpu.core_type = #tpu.core_type<tc>, window_params = [{transform_indices = @transform_0, window_bounds = array<i64: 1, 128>}, {pipeline_mode = #tpu.pipeline_mode<synchronous>, transform_indices = @transform_1, window_bounds = array<i64: 8, 1>}, {transform_indices = @transform_2, window_bounds = array<i64: 128, 17>}]} {
    %c0 = arith.constant 0 : index
    %c0_0 = arith.constant 0 : index
    %0 = vector.load %arg1[%c0, %c0_0] : memref<1x128xf32, #tpu.memory_space<vmem>>, vector<1x128xf32>
    %c0_1 = arith.constant 0 : index
    %c0_2 = arith.constant 0 : index
    %1 = vector.load %arg2[%c0_1, %c0_2] : memref<8x1xf32, #tpu.memory_space<vmem>>, vector<8x1xf32>
    %2 = vector.broadcast %1 : vector<8x1xf32> to vector<8x128xf32>
    %3 = vector.broadcast %0 : vector<1x128xf32> to vector<8x128xf32>
    %4 = arith.mulf %2, %3 : vector<8x128xf32>
    %cst = arith.constant 6.28318548 : f32
    %5 = vector.broadcast %cst : f32 to vector<8x128xf32>
    %6 = arith.mulf %4, %5 : vector<8x128xf32>
    %7 = math.sin %6 : vector<8x128xf32>
    %8 = math.cos %6 : vector<8x128xf32>
    %9 = vector.shape_cast %0 : vector<1x128xf32> to vector<1x128xf32>
    %10 = vector.broadcast %9 : vector<1x128xf32> to vector<8x128xf32>
    %11 = tpu.transpose %10, [1, 0] : vector<8x128xf32> -> vector<128x8xf32>
    %12 = vector.extract_strided_slice %11 {offsets = [0, 0], sizes = [128, 1], strides = [1, 1]} : vector<128x8xf32> to vector<128x1xf32>
    %c0_3 = arith.constant 0 : index
    %c0_4 = arith.constant 0 : index
    %13 = vector.load %arg3[%c0_3, %c0_4] : memref<128x17xf32, #tpu.memory_space<vmem>>, vector<128x1xf32>
    tpu.vector_store %arg3[%c0_3, %c0_4], %12 {strides = array<i32>} : memref<128x17xf32, #tpu.memory_space<vmem>>, vector<128x1xf32>,
    %14 = tpu.transpose %7, [1, 0] : vector<8x128xf32> -> vector<128x8xf32>
    %c0_5 = arith.constant 0 : index
    %c1 = arith.constant 1 : index
    %15 = vector.load %arg3[%c0_5, %c1] : memref<128x17xf32, #tpu.memory_space<vmem>>, vector<128x8xf32>
    tpu.vector_store %arg3[%c0_5, %c1], %14 {strides = array<i32>} : memref<128x17xf32, #tpu.memory_space<vmem>>, vector<128x8xf32>,
    %16 = tpu.transpose %8, [1, 0] : vector<8x128xf32> -> vector<128x8xf32>
    %c0_6 = arith.constant 0 : index
    %c9 = arith.constant 9 : index
    %17 = vector.load %arg3[%c0_6, %c9] : memref<128x17xf32, #tpu.memory_space<vmem>>, vector<128x8xf32>
    tpu.vector_store %arg3[%c0_6, %c9], %16 {strides = array<i32>} : memref<128x17xf32, #tpu.memory_space<vmem>>, vector<128x8xf32>,
    return
  }
  func.func @transform_0(%arg0: i32) -> (i32, i32) {
    %c0_i32 = arith.constant 0 : i32
    %c0_i32_0 = arith.constant 0 : i32
    return %c0_i32, %arg0 : i32, i32
  }
  func.func @transform_1(%arg0: i32) -> (i32, i32) {
    %c0_i32 = arith.constant 0 : i32
    %c0_i32_0 = arith.constant 0 : i32
    %c0_i32_1 = arith.constant 0 : i32
    return %c0_i32, %c0_i32_0 : i32, i32
  }
  func.func @transform_2(%arg0: i32) -> (i32, i32) {
    %c0_i32 = arith.constant 0 : i32
    %c0_i32_0 = arith.constant 0 : i32
    return %arg0, %c0_i32 : i32, i32
  }
}

</mosaic_0001>

<bundles_post_ra>
// kernel: tpu_custom_call.1
= control target key start
LH: loop header
LB: loop body
LE: loop exit
PB: predicated region body
PF: predicated region fallthrough
CT: control target
= control target key end

     0   :  { %v540_v0 = vmov 0   ;;  %v541_v17 = vmov 2102212464   ;;  %v542_v19 = vmov 920167782   ;;  %s547_s29 = smov 1   ;;  %s815_s1 = inlined_call_operand.vmem [shape: f32[8,1], index: 1, kind: input, shape index: {}]   ;;  %s816_s0 = inlined_call_operand.vmem [shape: f32[1,128], index: 0, kind: input, shape index: {}]   ;;  %s817_s2 = inlined_call_operand.vmem [shape: f32[128,17], index: 2, kind: output, shape index: {}]  }
   0x1   :  { %535 = vset.pattern.permute.xlu0 %v540_v0  ;;  %v12_v1 = vld [vmem:[%s815_s1] sm:$0xff]  ;;  %v543_v23 = vmov 1326507024   ;;  %v544_v25 = vmov 683565275   ;;  %s548_s14 = smov 9  }
   0x2   :  { %15 = vperm.xlu0 %535, %v12_v1   ;;  %v512_v2 = vld [vmem:[%s816_s0] ss:$0 sm:$0xff]  ;;  %v545_v27 = vmov 2475754826   ;;  %v546_v30 = vmov 2131351028  }
  0x20   :  { %233 = vxpose.xlu0.b32.start.end [1/1] (short) %v512_v2, 128 }
  0x81   :  { %v16_v3 = vpop.permute.xlu0 %15 }
  0x82   :  { %v24_v4 = vmul.f32 %v512_v2, %v16_v3 }
  0x84   :  { %v570_v5 = vmul.f32 6.2831855, %v24_v4 }
  0x86   :  { %v29_v6 = vand.u32 2139095040, %v570_v5  ;;  %v26_v7 = vand.u32 2147483647, %v570_v5  ;;  %vm28_vm7 = vcmp.lt.s32.totalorder %v570_v5, 0  ;;  %vm118_vm15 = vweird.f32 %v570_v5 }
  0x88   :  { %v30_v8 = vshrl.u32 %v29_v6, 23  ;;  %v33_v10 = vand.u32 8388607, %v26_v7  ;;  %vm27_vm8 = vcmp.le.f32.partialorder %v26_v7, 0.7853982 }
  0x8a   :  { %v513_v9 = vadd.s32 4294967169, %v30_v8  ;;  %v34_v13 = vor.u32 8388608, %v33_v10 }
  0x8c   :  { %v36_v11 = vadd.s32 1, %v513_v9  ;;  %v74_v21 = vshll.u32 %v34_v13, 8 }
  0x8e   :  { %vm37_vm0 = vcmp.gt.s32.totalorder %v36_v11, 0 }
  0x8f   :  { %v38_v12 = vsel %vm37_vm0, %v36_v11, 0  ;;  %vm265_vm0 = vcmask 7168  }
  0x90   :  { %v40_v14 = vand.u32 31, %v38_v12  ;;  %v39_v15 = vshrl.u32 %v38_v12, 5 }
  0x92   :  { %v41_v16 = vsub.s32 32, %v40_v14  ;;  %v52_v18 = vshll.u32 %v541_v17, %v40_v14  ;;  %v55_v20 = vshll.u32 %v542_v19, %v40_v14  ;;  %v43_v26 = vshll.u32 %v544_v25, %v40_v14 }
  0x93   :  { %v46_v29 = vshll.u32 %v545_v27, %v40_v14  ;;  %v49_v32 = vshll.u32 %v546_v30, %v40_v14  ;;  %vm61_vm1 = vcmp.lt.s32.totalorder %v39_v15, 4  ;;  %vm58_vm2 = vcmp.lt.s32.totalorder %v39_v15, 1 }
  0x94   :  { %v53_v22 = vshrl.u32 %v542_v19, %v41_v16  ;;  %v56_v24 = vshrl.u32 %v543_v23, %v41_v16  ;;  %v44_v28 = vshrl.u32 %v545_v27, %v41_v16  ;;  %v47_v31 = vshrl.u32 %v546_v30, %v41_v16 }
  0x95   :  { %v50_v33 = vshrl.u32 %v541_v17, %v41_v16  ;;  %v42_v37 = vshrl.u32 %v544_v25, %v41_v16  ;;  %vm59_vm3 = vcmp.lt.s32.totalorder %v39_v15, 2  ;;  %vm60_vm4 = vcmp.lt.s32.totalorder %v39_v15, 3 }
  0x96   :  { %v54_v34 = vor.u32 %v53_v22, %v52_v18  ;;  %v57_v35 = vor.u32 %v56_v24, %v55_v20  ;;  %v45_v36 = vor.u32 %v44_v28, %v43_v26  ;;  %v48_v38 = vor.u32 %v47_v31, %v46_v29 }
  0x97   :  { %v51_v39 = vor.u32 %v50_v33, %v49_v32 }
  0x98   :  { %v67_v40 = vsel %vm61_vm1, %v54_v34, 920167782  ;;  %v71_v41 = vsel %vm61_vm1, %v57_v35, 1326507024  ;;  %v66_v43 = vsel %vm58_vm2, %v45_v36, %v48_v38  ;;  %v62_v46 = vsel %vm58_vm2, %v42_v37, %v45_v36 }
  0x99   :  { %v63_v42 = vsel %vm61_vm1, %v51_v39, 2102212464  ;;  %v68_v44 = vsel %vm60_vm4, %v51_v39, %v67_v40  ;;  %v70_v45 = vsel %vm58_vm2, %v48_v38, %v51_v39  ;;  %v72_v49 = vsel %vm60_vm4, %v54_v34, %v71_v41 }
  0x9a   :  { %v64_v47 = vsel %vm60_vm4, %v48_v38, %v63_v42  ;;  %v69_v48 = vsel %vm59_vm3, %v66_v43, %v68_v44  ;;  %v73_v50 = vsel %vm59_vm3, %v70_v45, %v72_v49  ;;  %vm378_vm1 = vcmask 72712  }
  0x9b   :  { %v576_v51 = vmul.u32.u64.low %v74_v21, %v69_v48  ;;  %v577_v52 = vmul.u32.u64.high %v74_v21, %v69_v48, %v576_v51  ;;  %v579_v53 = vmul.u32.u64.low %v74_v21, %v73_v50  ;;  %v580_v54 = vmul.u32.u64.high %v74_v21, %v73_v50, %v579_v53 }
  0x9c   :  { %v65_v55 = vsel %vm59_vm3, %v62_v46, %v64_v47  ;;  %vm491_vm2 = vcmask 138312  }
  0x9d   :  { %v84_v56 = vadd.s32 1, %v577_v52  ;;  %v81_v57 = vmul.u32 %v74_v21, %v65_v55  ;;  %vm83_vm5 = vc.u32 %v580_v54, %v576_v51  ;;  %v82_v6 = vadd.s32 %v576_v51, %v580_v54 }
  0x9f   :  { %v85_v58 = vsel %vm83_vm5, %v84_v56, %v577_v52 }
  0xa0   :  { %v86_v59 = vadd.s32 %v85_v58, %v81_v57  ;;  %v249_v39 = vpop.trf.xlu0 }
  0xa1   :  { %266 = vst.msk [vmem:[%s817_s2] sm:$0xff] %vm265_vm0, %v249_v39 }
  0xa2   :  { %v87_v60 = vadd.s32 536870912, %v86_v59 }
  0xa4   :  { %v88_v61 = vshrl.u32 %v87_v60, 30  ;;  %v250_v40 = vpop.trf.xlu0 }
  0xa5   :  { %267 = vst.msk [vmem:[%s817_s2 + $0x8] sm:$0xff] %vm265_vm0, %v250_v40 }
  0xa6   :  { %v89_v62 = vshll.u32 %v88_v61, 30  ;;  %v112_v19 = vsub.s32 4, %v88_v61 }
  0xa8   :  { %v90_v63 = vsub.s32 %v86_v59, %v89_v62  ;;  %v113_v22 = vsel %vm28_vm7, %v112_v19, %v88_v61 }
  0xa9   :  { %v115_v24 = vsel %vm27_vm8, 0, %v113_v22 }
  0xaa   :  { %v92_v0 = vsub.s32 0, %v90_v63  ;;  %v119_v25 = vadd.s32 3, %v115_v24  ;;  %v223_v27 = vand.u32 3, %v115_v24 }
  0xac   :  { %v514_v1 = vmin.u32 %v92_v0, %v90_v63  ;;  %v120_v26 = vand.u32 3, %v119_v25  ;;  %vm228_vm10 = vcmp.eq.s32.totalorder %v223_v27, 2  ;;  %vm225_vm12 = vcmp.eq.s32.totalorder %v223_v27, 0 }
  0xad   :  { %vm224_vm14 = vcmp.lt.s32.totalorder %v223_v27, 2 }
  0xae   :  { %v94_v2 = vclz %v514_v1  ;;  %vm125_vm9 = vcmp.eq.s32.totalorder %v120_v26, 2  ;;  %vm122_vm11 = vcmp.eq.s32.totalorder %v120_v26, 0  ;;  %vm121_vm13 = vcmp.lt.s32.totalorder %v120_v26, 2 }
  0xb0   :  { %v515_v3 = vadd.s32 4294967294, %v94_v2 }
  0xb2   :  { %vm516_vm6 = vcmp.lt.s32.totalorder %v515_v3, 0 }
  0xb3   :  { %v97_v4 = vsel %vm516_vm6, 0, %v515_v3 }
  0xb4   :  { %v98_v8 = vsub.s32 32, %v97_v4  ;;  %v102_v9 = vsub.s32 4294967266, %v97_v4  ;;  %v99_v10 = vshll.u32 %v90_v63, %v97_v4 }
  0xb6   :  { %v100_v11 = vshrl.u32 %v82_v6, %v98_v8  ;;  %v103_v12 = vadd.s32 127, %v102_v9 }
  0xb8   :  { %v101_v13 = vor.u32 %v100_v11, %v99_v10  ;;  %v104_v14 = vshll.u32 %v103_v12, 23 }
  0xba   :  { %v105_v15 = vor.u32 4788187, %v104_v14  ;;  %v108_v17 = vcvt.s32.f32 %v101_v13 }
  0xbc   :  { %v106_v16 = vand.u32 2147483647, %v105_v15 }
  0xbe   :  { %v109_v18 = vmul.f32 %v108_v17, %v106_v16 }
  0xc0   :  { %v110_v20 = vxor.u32 2147483648, %v109_v18 }
  0xc2   :  { %v111_v21 = vsel %vm28_vm7, %v110_v20, %v109_v18 }
  0xc3   :  { %v114_v23 = vsel %vm27_vm8, %v570_v5, %v111_v21  ;;  %v251_v5 = vpop.trf.xlu0 }
  0xc4   :  { %536 = vcosq.f32 %v114_v23  ;;  %268 = vst.msk [vmem:[%s817_s2 + $0x10] sm:$0xff] %vm265_vm0, %v251_v5 }
  0xc5   :  { %538 = vsinq.f32 %v114_v23 }
  0xc7   :  { %v252_v41 = vpop.trf.xlu0 }
  0xc8   :  { %269 = vst.msk [vmem:[%s817_s2 + $0x18] sm:$0xff] %vm265_vm0, %v252_v41 }
  0xcb   :  { %v253_v43 = vpop.trf.xlu0 }
  0xcc   :  { %270 = vst.msk [vmem:[%s817_s2 + $0x20] sm:$0xff] %vm265_vm0, %v253_v43 }
  0xce   :  { %v537_v28 = vpop.eup %536 }
  0xcf   :  { %v539_v29 = vpop.eup %538  ;;  %v126_v30 = vxor.u32 2147483648, %v537_v28  ;;  %v254_v45 = vpop.trf.xlu0 }
  0xd0   :  { %v123_v31 = vxor.u32 2147483648, %v539_v29  ;;  %271 = vst.msk [vmem:[%s817_s2 + $0x28] sm:$0xff] %vm265_vm0, %v254_v45 }
  0xd1   :  { %v127_v32 = vsel %vm125_vm9, %v126_v30, %v539_v29  ;;  %v230_v7 = vsel %vm228_vm10, %v126_v30, %v539_v29 }
  0xd2   :  { %v124_v33 = vsel %vm122_vm11, %v537_v28, %v123_v31  ;;  %v227_v34 = vsel %vm225_vm12, %v537_v28, %v123_v31 }
  0xd3   :  { %v128_v35 = vsel %vm121_vm13, %v124_v33, %v127_v32  ;;  %v231_v36 = vsel %vm224_vm14, %v227_v34, %v230_v7  ;;  %v255_v47 = vpop.trf.xlu0 }
  0xd4   :  { %v129_v37 = vsel %vm118_vm15, nan, %v128_v35  ;;  %v232_v38 = vsel %vm118_vm15, nan, %v231_v36  ;;  %272 = vst.msk [vmem:[%s817_s2 + $0x30] sm:$0xff] %vm265_vm0, %v255_v47 }
  0xd5   :  { %282 = vxpose.xlu1.b32.start.end [1/1] (short) %v129_v37, 128 }
  0xd7   :  { %v256_v49 = vpop.trf.xlu0 }
  0xd8   :  { %273 = vst.msk [vmem:[%s817_s2 + $0x38] sm:$0xff] %vm265_vm0, %v256_v49 }
  0xdb   :  { %v257_v51 = vpop.trf.xlu0 }
  0xdc   :  { %274 = vst.msk [vmem:[%s817_s2 + $0x40] sm:$0xff] %vm265_vm0, %v257_v51 }
  0xdf   :  { %v258_v53 = vpop.trf.xlu0 }
  0xe0   :  { %275 = vst.msk [vmem:[%s817_s2 + $0x48] sm:$0xff] %vm265_vm0, %v258_v53 }
  0xe3   :  { %v259_v55 = vpop.trf.xlu0 }
  0xe4   :  { %276 = vst.msk [vmem:[%s817_s2 + $0x50] sm:$0xff] %vm265_vm0, %v259_v55 }
  0xe7   :  { %v260_v57 = vpop.trf.xlu0 }
  0xe8   :  { %277 = vst.msk [vmem:[%s817_s2 + $0x58] sm:$0xff] %vm265_vm0, %v260_v57 }
  0xeb   :  { %v261_v59 = vpop.trf.xlu0 }
  0xec   :  { %278 = vst.msk [vmem:[%s817_s2 + $0x60] sm:$0xff] %vm265_vm0, %v261_v59 }
  0xef   :  { %v262_v61 = vpop.trf.xlu0 }
  0xf0   :  { %279 = vst.msk [vmem:[%s817_s2 + $0x68] sm:$0xff] %vm265_vm0, %v262_v61 }
  0xf3   :  { %v263_v63 = vpop.trf.xlu0 }
  0xf4   :  { %280 = vst.msk [vmem:[%s817_s2 + $0x70] sm:$0xff] %vm265_vm0, %v263_v63 }
  0xf7   :  { %v264_v1 = vpop.trf.xlu0 }
  0xf8   :  { %281 = vst.msk [vmem:[%s817_s2 + $0x78] sm:$0xff] %vm265_vm0, %v264_v1 }
 0x112   :  { %395 = vxpose.xlu1.b32.start.end [1/1] (short) %v232_v38, 128 }
 0x155   :  { %v298_v42 = vpop.trf.xlu1 }
 0x159   :  { %v299_v44 = vpop.trf.xlu1 }
 0x15d   :  { %v300_v46 = vpop.trf.xlu1 }
 0x161   :  { %v301_v48 = vpop.trf.xlu1 }
 0x165   :  { %v302_v50 = vpop.trf.xlu1 }
 0x169   :  { %v303_v52 = vpop.trf.xlu1 }
 0x16c   :  { %330 = vrot.lane.b32.xlu1 %v298_v42, %s547_s29 }
 0x16d   :  { %v304_v54 = vpop.trf.xlu1 }
 0x170   :  { %334 = vrot.lane.b32.xlu1 %v300_v46, %s547_s29 }
 0x171   :  { %v305_v56 = vpop.trf.xlu1 }
 0x174   :  { %340 = vrot.lane.b32.xlu1 %v303_v52, %s547_s29 }
 0x175   :  { %v306_v58 = vpop.trf.xlu1 }
 0x179   :  { %v307_v60 = vpop.trf.xlu1 }
 0x17d   :  { %v308_v62 = vpop.trf.xlu1 }
 0x181   :  { %v309_v0 = vpop.trf.xlu1 }
 0x185   :  { %v310_v2 = vpop.trf.xlu1 }
 0x189   :  { %v311_v3 = vpop.trf.xlu1 }
 0x18d   :  { %v312_v4 = vpop.trf.xlu1 }
 0x191   :  { %v313_v6 = vpop.trf.xlu1 }
 0x195   :  { %v411_v8 = vpop.trf.xlu1 }
 0x196   :  { %443 = vrot.lane.b32.xlu0 %v411_v8, %s548_s14 }
 0x199   :  { %v412_v9 = vpop.trf.xlu1 }
 0x19a   :  { %332 = vrot.lane.b32.xlu0 %v299_v44, %s547_s29 }
 0x19d   :  { %v413_v10 = vpop.trf.xlu1 }
 0x19e   :  { %445 = vrot.lane.b32.xlu0 %v412_v9, %s548_s14 }
 0x1a1   :  { %v414_v11 = vpop.trf.xlu1 }
 0x1a2   :  { %447 = vrot.lane.b32.xlu0 %v413_v10, %s548_s14 }
 0x1a5   :  { %v415_v12 = vpop.trf.xlu1 }
 0x1a6   :  { %336 = vrot.lane.b32.xlu0 %v301_v48, %s547_s29 }
 0x1a9   :  { %v416_v13 = vpop.trf.xlu1 }
 0x1aa   :  { %449 = vrot.lane.b32.xlu0 %v414_v11, %s548_s14 }
 0x1ad   :  { %v417_v14 = vpop.trf.xlu1 }
 0x1ae   :  { %338 = vrot.lane.b32.xlu0 %v302_v50, %s547_s29 }
 0x1b1   :  { %v418_v15 = vpop.trf.xlu1 }
 0x1b2   :  { %451 = vrot.lane.b32.xlu0 %v415_v12, %s548_s14 }
 0x1b5   :  { %v419_v16 = vpop.trf.xlu1 }
 0x1b6   :  { %453 = vrot.lane.b32.xlu0 %v416_v13, %s548_s14 }
 0x1b9   :  { %v420_v17 = vpop.trf.xlu1 }
 0x1ba   :  { %342 = vrot.lane.b32.xlu0 %v304_v54, %s547_s29 }
 0x1bd   :  { %v421_v18 = vpop.trf.xlu1 }
 0x1be   :  { %455 = vrot.lane.b32.xlu0 %v417_v14, %s548_s14 }
 0x1c1   :  { %v422_v19 = vpop.trf.xlu1 }
 0x1c2   :  { %344 = vrot.lane.b32.xlu0 %v305_v56, %s547_s29 }
 0x1c5   :  { %v423_v20 = vpop.trf.xlu1 }
 0x1c6   :  { %457 = vrot.lane.b32.xlu0 %v418_v15, %s548_s14  ;;  %467 = vrot.lane.b32.xlu1 %v423_v20, %s548_s14 }
 0x1c9   :  { %v424_v21 = vpop.trf.xlu1 }
 0x1ca   :  { %346 = vrot.lane.b32.xlu0 %v306_v58, %s547_s29 }
 0x1cd   :  { %v425_v22 = vpop.trf.xlu1 }
 0x1ce   :  { %459 = vrot.lane.b32.xlu0 %v419_v16, %s548_s14  ;;  %471 = vrot.lane.b32.xlu1 %v425_v22, %s548_s14 }
 0x1d1   :  { %v426_v23 = vpop.trf.xlu1 }
 0x1d2   :  { %348 = vrot.lane.b32.xlu0 %v307_v60, %s547_s29 }
 0x1d6   :  { %461 = vrot.lane.b32.xlu0 %v420_v17, %s548_s14 }
 0x1da   :  { %350 = vrot.lane.b32.xlu0 %v308_v62, %s547_s29 }
 0x1de   :  { %463 = vrot.lane.b32.xlu0 %v421_v18, %s548_s14  ;;  %v331_v24 = vpop.permute.xlu1 %330 }
 0x1df   :  { %379 = vst.msk [vmem:[%s817_s2] sm:$0xff] %vm378_vm1, %v331_v24 }
 0x1e2   :  { %352 = vrot.lane.b32.xlu0 %v309_v0, %s547_s29  ;;  %v335_v25 = vpop.permute.xlu1 %334 }
 0x1e3   :  { %381 = vst.msk [vmem:[%s817_s2 + $0x10] sm:$0xff] %vm378_vm1, %v335_v25 }
 0x1e6   :  { %465 = vrot.lane.b32.xlu0 %v422_v19, %s548_s14  ;;  %v341_v26 = vpop.permute.xlu1 %340 }
 0x1e7   :  { %384 = vst.msk [vmem:[%s817_s2 + $0x28] sm:$0xff] %vm378_vm1, %v341_v26 }
 0x1ea   :  { %354 = vrot.lane.b32.xlu0 %v310_v2, %s547_s29 }
 0x1ee   :  { %356 = vrot.lane.b32.xlu0 %v311_v3, %s547_s29 }
 0x1f2   :  { %469 = vrot.lane.b32.xlu0 %v424_v21, %s548_s14 }
 0x1f6   :  { %358 = vrot.lane.b32.xlu0 %v312_v4, %s547_s29 }
 0x1fa   :  { %360 = vrot.lane.b32.xlu0 %v313_v6, %s547_s29 }
 0x1fe   :  { %473 = vrot.lane.b32.xlu0 %v426_v23, %s548_s14 }
 0x208   :  { %v444_v27 = vpop.permute.xlu0 %443 }
 0x209   :  { %492 = vst.msk [vmem:[%s817_s2] sm:$0xff] %vm491_vm2, %v444_v27 }
 0x20c   :  { %v333_v28 = vpop.permute.xlu0 %332 }
 0x20d   :  { %380 = vst.msk [vmem:[%s817_s2 + $0x8] sm:$0xff] %vm378_vm1, %v333_v28 }
 0x210   :  { %v446_v29 = vpop.permute.xlu0 %445 }
 0x211   :  { %493 = vst.msk [vmem:[%s817_s2 + $0x8] sm:$0xff] %vm491_vm2, %v446_v29 }
 0x214   :  { %v448_v30 = vpop.permute.xlu0 %447 }
 0x215   :  { %494 = vst.msk [vmem:[%s817_s2 + $0x10] sm:$0xff] %vm491_vm2, %v448_v30 }
 0x218   :  { %v337_v31 = vpop.permute.xlu0 %336 }
 0x219   :  { %382 = vst.msk [vmem:[%s817_s2 + $0x18] sm:$0xff] %vm378_vm1, %v337_v31 }
 0x21c   :  { %v450_v32 = vpop.permute.xlu0 %449 }
 0x21d   :  { %495 = vst.msk [vmem:[%s817_s2 + $0x18] sm:$0xff] %vm491_vm2, %v450_v32 }
 0x220   :  { %v339_v7 = vpop.permute.xlu0 %338 }
 0x221   :  { %383 = vst.msk [vmem:[%s817_s2 + $0x20] sm:$0xff] %vm378_vm1, %v339_v7 }
 0x224   :  { %v452_v33 = vpop.permute.xlu0 %451 }
 0x225   :  { %496 = vst.msk [vmem:[%s817_s2 + $0x20] sm:$0xff] %vm491_vm2, %v452_v33 }
 0x228   :  { %v454_v34 = vpop.permute.xlu0 %453 }
 0x229   :  { %497 = vst.msk [vmem:[%s817_s2 + $0x28] sm:$0xff] %vm491_vm2, %v454_v34 }
 0x22c   :  { %v343_v35 = vpop.permute.xlu0 %342 }
 0x22d   :  { %385 = vst.msk [vmem:[%s817_s2 + $0x30] sm:$0xff] %vm378_vm1, %v343_v35 }
 0x230   :  { %v456_v36 = vpop.permute.xlu0 %455 }
 0x231   :  { %498 = vst.msk [vmem:[%s817_s2 + $0x30] sm:$0xff] %vm491_vm2, %v456_v36 }
 0x234   :  { %v345_v37 = vpop.permute.xlu0 %344 }
 0x235   :  { %386 = vst.msk [vmem:[%s817_s2 + $0x38] sm:$0xff] %vm378_vm1, %v345_v37 }
 0x238   :  { %v458_v38 = vpop.permute.xlu0 %457  ;;  %v468_v46 = vpop.permute.xlu1 %467 }
 0x239   :  { %499 = vst.msk [vmem:[%s817_s2 + $0x38] sm:$0xff] %vm491_vm2, %v458_v38 }
 0x23c   :  { %v347_v39 = vpop.permute.xlu0 %346 }
 0x23d   :  { %387 = vst.msk [vmem:[%s817_s2 + $0x40] sm:$0xff] %vm378_vm1, %v347_v39 }
 0x240   :  { %v460_v40 = vpop.permute.xlu0 %459  ;;  %v472_v50 = vpop.permute.xlu1 %471 }
 0x241   :  { %500 = vst.msk [vmem:[%s817_s2 + $0x40] sm:$0xff] %vm491_vm2, %v460_v40 }
 0x244   :  { %v349_v5 = vpop.permute.xlu0 %348 }
 0x245   :  { %388 = vst.msk [vmem:[%s817_s2 + $0x48] sm:$0xff] %vm378_vm1, %v349_v5 }
 0x248   :  { %v462_v41 = vpop.permute.xlu0 %461 }
 0x249   :  { %501 = vst.msk [vmem:[%s817_s2 + $0x48] sm:$0xff] %vm491_vm2, %v462_v41 }
 0x24c   :  { %v351_v42 = vpop.permute.xlu0 %350 }
 0x24d   :  { %389 = vst.msk [vmem:[%s817_s2 + $0x50] sm:$0xff] %vm378_vm1, %v351_v42 }
 0x250   :  { %v464_v43 = vpop.permute.xlu0 %463 }
 0x251   :  { %502 = vst.msk [vmem:[%s817_s2 + $0x50] sm:$0xff] %vm491_vm2, %v464_v43 }
 0x254   :  { %v353_v44 = vpop.permute.xlu0 %352 }
 0x255   :  { %390 = vst.msk [vmem:[%s817_s2 + $0x58] sm:$0xff] %vm378_vm1, %v353_v44 }
 0x258   :  { %v466_v45 = vpop.permute.xlu0 %465 }
 0x259   :  { %503 = vst.msk [vmem:[%s817_s2 + $0x58] sm:$0xff] %vm491_vm2, %v466_v45 }
 0x25c   :  { %v355_v47 = vpop.permute.xlu0 %354 }
 0x25d   :  { %391 = vst.msk [vmem:[%s817_s2 + $0x60] sm:$0xff] %vm378_vm1, %v355_v47 }
 0x25e   :  { %504 = vst.msk [vmem:[%s817_s2 + $0x60] sm:$0xff] %vm491_vm2, %v468_v46 }
 0x260   :  { %v357_v48 = vpop.permute.xlu0 %356 }
 0x261   :  { %392 = vst.msk [vmem:[%s817_s2 + $0x68] sm:$0xff] %vm378_vm1, %v357_v48 }
 0x264   :  { %v470_v49 = vpop.permute.xlu0 %469 }
 0x265   :  { %505 = vst.msk [vmem:[%s817_s2 + $0x68] sm:$0xff] %vm491_vm2, %v470_v49 }
 0x268   :  { %v359_v51 = vpop.permute.xlu0 %358 }
 0x269   :  { %393 = vst.msk [vmem:[%s817_s2 + $0x70] sm:$0xff] %vm378_vm1, %v359_v51 }
 0x26a   :  { %506 = vst.msk [vmem:[%s817_s2 + $0x70] sm:$0xff] %vm491_vm2, %v472_v50 }
 0x26c   :  { %v361_v52 = vpop.permute.xlu0 %360 }
 0x26d   :  { %394 = vst.msk [vmem:[%s817_s2 + $0x78] sm:$0xff] %vm378_vm1, %v361_v52 }
 0x270   :  { %v474_v53 = vpop.permute.xlu0 %473 }
 0x271   :  { %507 = vst.msk [vmem:[%s817_s2 + $0x78] sm:$0xff] %vm491_vm2, %v474_v53 }

</bundles_post_ra>
